<compile_context>
chip_gen: v5e
topology: v5e:2x2
jax: 0.10.0
libtpu: 0.0.40
codegen_flags: <defaults>
</compile_context>

<pallas_src>
import jax
import jax.numpy as jnp
from jax.experimental import pallas as pl
from jax.experimental.pallas import tpu as pltpu


def _affine_kernel(x_ref, a_ref, b_ref, o_ref):
    # x_ref: (r_tile, t_lane) native dtype; a_ref/b_ref: (r_tile, 1) f32.
    x = x_ref[...].astype(jnp.float32)
    o_ref[...] = (x * a_ref[...] + b_ref[...]).astype(o_ref.dtype)


def _pick_tiles(R, HW, itemsize, budget=2 * 1024 * 1024):
    """Pick (r_tile, t_lane) block dims for the (R, HW) = (B*C, H*W) view.

    TPU block rule: the last two block dims must be multiples of (8, 128)
    respectively OR equal the full array dims.  Targets ~`budget` bytes per
    x/out block (safe on v7x's 64 MiB VMEM with double buffering + f32
    compute temporaries) and avoids a (1, 1) grid so both v7x TensorCores
    get work.
    """
    min_rows = 8 if R >= 8 else R

    # Lane tile: full spatial extent when a `min_rows`-row slab fits the
    # budget (full-extent blocks are legal for any HW, incl. non-128
    # multiples); otherwise the largest 128-multiple that fits, with the
    # ragged tail handled by pl.cdiv + masked partial blocks.
    lane_cap = max(128, ((budget // max(1, min_rows * itemsize)) // 128) * 128)
    t_lane = HW if HW <= lane_cap else lane_cap

    # Row tile: fold as many batch*channel rows as still fit the budget
    # (amortizes the ~0.35 us per-grid-step cost for small per-image maps).
    rows_fit = max(1, budget // max(1, t_lane * itemsize))
    if rows_fit >= R:
        r_tile = R
    elif R >= 8:
        r_tile = max(8, (rows_fit // 8) * 8)
    else:
        r_tile = R

    # Megacore (v7x): if everything landed in a single block, split one axis
    # in two so a 'parallel' grid axis has >= 2 steps.
    if r_tile >= R and t_lane >= HW:
        if HW >= 256:
            t_lane = ((-(-HW // 2) + 127) // 128) * 128
        elif R >= 16:
            r_tile = ((-(-R // 2) + 7) // 8) * 8

    return r_tile, t_lane


def affine(x, alpha, beta):
    """x: (B, C, H, W); alpha, beta: (1, C, 1, 1). Returns x * alpha + beta
    (computed in f32, result cast back to x.dtype)."""
    B, C, H, W = x.shape
    HW = H * W
    R = B * C
    N = R * HW
    itemsize = jnp.dtype(x.dtype).itemsize

    # Contiguous, transpose-free 2-D view: rows = batch*channel, lanes = H*W.
    x2 = x.reshape(R, HW)

    # Tiny per-row f32 parameter vectors (R*4 bytes each).
    a2 = jnp.broadcast_to(alpha.astype(jnp.float32).reshape(1, C, 1),
                          (B, C, 1)).reshape(R, 1)
    b2 = jnp.broadcast_to(beta.astype(jnp.float32).reshape(1, C, 1),
                          (B, C, 1)).reshape(R, 1)

    r_tile, t_lane = _pick_tiles(R, HW, itemsize)
    grid = (pl.cdiv(R, r_tile), pl.cdiv(HW, t_lane))

    x_spec = pl.BlockSpec((r_tile, t_lane), lambda r, s: (r, s))
    p_spec = pl.BlockSpec((r_tile, 1), lambda r, s: (r, 0))

    # Explicit scoped-VMEM sizing (double-buffered in/out blocks, f32 compute
    # temporaries, padded (r_tile, 1)->(r_tile, 128) param blocks) + headroom.
    blk = r_tile * t_lane * itemsize
    blk_f32 = r_tile * t_lane * 4
    param_blk = ((r_tile + 7) // 8) * 8 * 128 * 4
    needed = 2 * 2 * blk + 2 * blk_f32 + 2 * 2 * 2 * param_blk
    vmem_limit = int(min(64 * 1024 * 1024, max(32 * 1024 * 1024, 2 * needed)))

    cost = pl.CostEstimate(
        flops=2 * N,
        transcendentals=0,
        bytes_accessed=2 * N * itemsize + 2 * R * 4,
    )

    out2 = pl.pallas_call(
        _affine_kernel,
        out_shape=jax.ShapeDtypeStruct((R, HW), x.dtype),
        grid_spec=pltpu.PrefetchScalarGridSpec(
            num_scalar_prefetch=0,
            grid=grid,
            in_specs=[x_spec, p_spec, p_spec],
            out_specs=x_spec,
        ),
        compiler_params=pltpu.CompilerParams(
            dimension_semantics=("parallel", "parallel"),
            vmem_limit_bytes=vmem_limit,
        ),
        cost_estimate=cost,
    )(x2, a2, b2)

    return out2.reshape(B, C, H, W)


if __name__ == "__main__":
    key = jax.random.PRNGKey(0)

    # --- Main check: module-consistent small shapes (B=2, dim=4, 16x16) ---
    B, C, H, W = 2, 4, 16, 16
    k1, k2, k3 = jax.random.split(key, 3)
    alpha = jnp.ones((1, C, 1, 1), jnp.float32) + 0.1 * jax.random.normal(
        k1, (1, C, 1, 1), jnp.float32)
    beta = jnp.zeros((1, C, 1, 1), jnp.float32) + 0.1 * jax.random.normal(
        k2, (1, C, 1, 1), jnp.float32)
    x = jax.random.normal(k3, (B, C, H, W), jnp.float32)

    out = jax.block_until_ready(affine(x, alpha, beta))
    ref = x * alpha + beta
    assert out.shape == (B, C, H, W)
    assert jnp.allclose(out, ref, atol=1e-6, rtol=1e-6), "fp32 mismatch vs reference"

    # --- bf16 storage path: data stays bf16 on HBM, compute in f32 ---
    x_bf16 = x.astype(jnp.bfloat16)
    out_bf16 = jax.block_until_ready(affine(x_bf16, alpha, beta))
    ref_bf16 = (x_bf16.astype(jnp.float32) * alpha + beta).astype(jnp.bfloat16)
    assert out_bf16.dtype == jnp.bfloat16
    assert jnp.allclose(out_bf16.astype(jnp.float32),
                        ref_bf16.astype(jnp.float32), atol=1e-2, rtol=1e-2)

    # --- Wide-channel, small-spatial path (no transposes, masked-lane stores) ---
    Bc, Cc, Hc, Wc = 2, 128, 4, 4
    k4, k5, k6 = jax.random.split(jax.random.PRNGKey(1), 3)
    alpha_c = 1.0 + 0.1 * jax.random.normal(k4, (1, Cc, 1, 1), jnp.float32)
    beta_c = 0.1 * jax.random.normal(k5, (1, Cc, 1, 1), jnp.float32)
    x_c = jax.random.normal(k6, (Bc, Cc, Hc, Wc), jnp.float32)
    out_c = jax.block_until_ready(affine(x_c, alpha_c, beta_c))
    ref_c = x_c * alpha_c + beta_c
    assert jnp.allclose(out_c, ref_c, atol=1e-6, rtol=1e-6), "wide-C mismatch"

    # --- Ragged spatial size (HW not a multiple of 128) under the byte budget ---
    Br, Cr, Hr, Wr = 2, 8, 20, 20
    k7 = jax.random.PRNGKey(2)
    x_r = jax.random.normal(k7, (Br, Cr, Hr, Wr), jnp.float32)
    alpha_r = jnp.ones((1, Cr, 1, 1), jnp.float32) * 1.5
    beta_r = jnp.ones((1, Cr, 1, 1), jnp.float32) * -0.25
    out_r = jax.block_until_ready(affine(x_r, alpha_r, beta_r))
    ref_r = x_r * alpha_r + beta_r
    assert jnp.allclose(out_r, ref_r, atol=1e-6, rtol=1e-6), "ragged-HW mismatch"

    print("KERNEL_OK")
</pallas_src>

<mosaic_0001>
module attributes {stable_mosaic.version = 11 : i64} {
  func.func @_affine_kernel(%arg0: i32, %arg1: i32, %arg2: memref<8x128xf32, #tpu.memory_space<vmem>>, %arg3: memref<8x1xf32, #tpu.memory_space<vmem>>, %arg4: memref<8x1xf32, #tpu.memory_space<vmem>>, %arg5: memref<8x128xf32, #tpu.memory_space<vmem>>) attributes {dimension_semantics = [#tpu.dimension_semantics<parallel>, #tpu.dimension_semantics<parallel>], iteration_bounds = array<i64: 1, 2>, scalar_prefetch = 0 : i64, scratch_operands = 0 : i64, tpu.core_type = #tpu.core_type<tc>, window_params = [{transform_indices = @transform_0, window_bounds = array<i64: 8, 128>}, {transform_indices = @transform_1, window_bounds = array<i64: 8, 1>}, {transform_indices = @transform_2, window_bounds = array<i64: 8, 1>}, {transform_indices = @transform_3, window_bounds = array<i64: 8, 128>}]} {
    %c0 = arith.constant 0 : index
    %c0_0 = arith.constant 0 : index
    %0 = vector.load %arg2[%c0, %c0_0] : memref<8x128xf32, #tpu.memory_space<vmem>>, vector<8x128xf32>
    %c0_1 = arith.constant 0 : index
    %c0_2 = arith.constant 0 : index
    %1 = vector.load %arg3[%c0_1, %c0_2] : memref<8x1xf32, #tpu.memory_space<vmem>>, vector<8x1xf32>
    %2 = vector.broadcast %1 : vector<8x1xf32> to vector<8x128xf32>
    %3 = arith.mulf %0, %2 : vector<8x128xf32>
    %c0_3 = arith.constant 0 : index
    %c0_4 = arith.constant 0 : index
    %4 = vector.load %arg4[%c0_3, %c0_4] : memref<8x1xf32, #tpu.memory_space<vmem>>, vector<8x1xf32>
    %5 = vector.broadcast %4 : vector<8x1xf32> to vector<8x128xf32>
    %6 = arith.addf %3, %5 : vector<8x128xf32>
    %c0_5 = arith.constant 0 : index
    %c0_6 = arith.constant 0 : index
    %7 = vector.load %arg5[%c0_5, %c0_6] : memref<8x128xf32, #tpu.memory_space<vmem>>, vector<8x128xf32>
    tpu.vector_store %arg5[%c0_5, %c0_6], %6 {strides = array<i32>} : memref<8x128xf32, #tpu.memory_space<vmem>>, vector<8x128xf32>,
    return
  }
  func.func @transform_0(%arg0: i32, %arg1: i32) -> (i32, i32) {
    %c0_i32 = arith.constant 0 : i32
    return %arg0, %arg1 : i32, i32
  }
  func.func @transform_1(%arg0: i32, %arg1: i32) -> (i32, i32) {
    %c0_i32 = arith.constant 0 : i32
    %c0_i32_0 = arith.constant 0 : i32
    return %arg0, %c0_i32 : i32, i32
  }
  func.func @transform_2(%arg0: i32, %arg1: i32) -> (i32, i32) {
    %c0_i32 = arith.constant 0 : i32
    %c0_i32_0 = arith.constant 0 : i32
    return %arg0, %c0_i32 : i32, i32
  }
  func.func @transform_3(%arg0: i32, %arg1: i32) -> (i32, i32) {
    %c0_i32 = arith.constant 0 : i32
    return %arg0, %arg1 : i32, i32
  }
}

</mosaic_0001>

<bundles_post_ra>
// kernel: tpu_custom_call.1
= control target key start
LH: loop header
LB: loop body
LE: loop exit
PB: predicated region body
PF: predicated region fallthrough
CT: control target
= control target key end

     0   :  { %8 = vsyncpa [#allocation3], 0  ;;  %s641_s0 = inlined_call_operand.vmem [shape: f32[8,256], index: 0, kind: input, shape index: {}]   ;;  %s642_s1 = inlined_call_operand.vmem [shape: f32[8,1], index: 1, kind: input, shape index: {}]   ;;  %s643_s2 = inlined_call_operand.vmem [shape: f32[8,1], index: 2, kind: input, shape index: {}]   ;;  %s644_s3 = inlined_call_operand.hbm [shape: f32[8,256], index: 3, kind: output, shape index: {}]  }
   0x1   :  { %10 = vsyncpa [#allocation3 + $0x1], 0  ;;  %s538_s12 = smov 0   ;;  %s540_s13 = smov 0  }
   0x2   :  { %s542_s14 = smov 0   ;;  %s544_s15 = smov 0  }
   0x3   :  { %s546_s16 = smov 0   ;;  %s548_s17 = smov 0  }
   0x4 LB: > { %s367_s18 = sadd.s32 4294967295, %s515_s17   ;;  %s368_s19 = sadd.s32 4294967294, %s515_s17   ;;  %s515_s17 = sphi %s548_s17, %s16_s17   ;;  %s511_s16 = sphi %s546_s16, %s651_s16   ;;  %s507_s15 = sphi %s544_s15, %s650_s15   ;;  %s503_s14 = sphi %s542_s14, %s649_s14   ;;  %s499_s13 = sphi %s540_s13, %s648_s13   ;;  %s495_s12 = sphi %s538_s12, %s647_s12  }
   0x5   : > { %s25_s20 = sadd.s32 1, %s511_s16  ;;  %s117_s21 = sadd.s32 1, %s503_s14 }
   0x6   : > { %p26_p0 = scmp.ge.s32.totalorder %s25_s20, 2  ;;  %p127_p1 = scmp.ne.s32.totalorder %s503_s14, %s499_s13 }
   0x7   : > { %p128_p2 = scmp.eq.s32.totalorder %s367_s18, 1  ;;  %p133_p3 = scmp.ne.s32.totalorder %s499_s13, %s495_s12 }
   0x8   : > { %s653_s20 = smov (%p26_p0, %s25_s20), 0  ;;  %p134_p5 = scmp.eq.s32.totalorder %s368_s19, 1 }
   0x9   : > { %p578_p4 = por %p128_p2, %p127_p1  ;;  %s113_s23 = ssub.s32 %s511_s16, %s653_s20 }
   0xa   : > { %p373_p6 = scmp.ge.s32.totalorder %s515_s17, 1  ;;  %p115_p7 = scmp.eq.s32.totalorder %s113_s23, 0 }
   0xb   : > { %p585_p8 = por %p134_p5, %p133_p3  ;;  %p177_p9 = scmp.lt.s32.totalorder %s515_s17, 3 }
   0xc   : > { %s591_s25 = scalar_select %p115_p7, %s503_s14, %s117_s21  }
   0xd   : > { %p178_p10 = pnand %p373_p6, %p177_p9 }
   0xe   : > { %p214_p11 = scmp.lt.s32.totalorder (!%p178_p10), %s507_s15, 1  ;;  %s209_s4 = sand.u32 (!%p178_p10), 1, %s499_s13  }
   0xf   : > { %181 = sbr.rel (%p178_p10) target bundleno = 150 (0x96), region = 32  ;;  %s374_s6 = sshll.u32 (!%p178_p10), %s209_s4, 3 }
  0x10   : > { %s377_s7 = sshll.u32 (!%p178_p10), %s507_s15, 3  ;;  %s211_s21 = scalar_lea.vmem (!%p178_p10), [#allocation2], %s374_s6 }
  0x11   : > { %s257_s19 = scalar_lea.hbm (!%p178_p10), %s644_s3, %s377_s7  ;;  %s259_s23 = sshll.u32 (!%p178_p10), %s211_s21, 4  ;;  %s260_s23 = int_to_ptr.vmem [resolvable:$true] %s259_s23 }
  0x12   : > { %s261_s26 = sshll.u32 (!%p178_p10), %s257_s19, 4  ;;  %s262_s26 = int_to_ptr.hbm [resolvable:$true] %s261_s26 }
  0x13   : > { %s451_s27 = sshra.s32 (!%p178_p10), %s262_s26, 4  ;;  %s452_s27 = int_to_ptr.hbm [resolvable:$true] %s451_s27 }
  0x14   : > { %v229_v0 = vld [vmem:[%s642_s1] sm:$0xff]  ;;  %v517_v1 = vmov 0   ;;  %s215_s30 = scalar_select %p214_p11, %s507_s15, 1 }
  0x15   : > { %436 = vset.pattern.permute.xlu0 %v517_v1  ;;  %v236_v2 = vld [vmem:[%s643_s2] sm:$0xff]  ;;  %s245_s15 = scalar_lea.sflag [#allocation3], %s209_s4  ;;  %s453_s28 = scalar_lea.hbm %s452_s27, 8 }
  0x16   : > { %232 = vperm.xlu0 %436, %v229_v0   ;;  %s375_s5 = sshll.u32 %s215_s30, 3  ;;  %p454_p12 = scmp.ne.s32.totalorder %s452_s27, %s453_s28 }
  0x17   : > { %s219_s10 = scalar_lea.vmem %s641_s0, %s375_s5  ;;  %s457_s5 = scalar_lea.hbm %s644_s3, 16 }
  0x18   : > { %v228_v4 = vld [vmem:[%s219_s10] sm:$0xff]  ;;  %p455_p13 = pnand %p454_p12, %p578_p4  ;;  %p458_p1 = scmp.lt.s32.totalorder %s452_s27, %s644_s3 }
  0x19   : > { %p459_p2 = scmp.lt.s32.totalorder %s457_s5, %s453_s28 }
  0x1a   : > { %p456_p0 = pneg %p455_p13 }
  0x1b   : > { %p460_p3 = por %p459_p2, %p458_p1 }
  0x1d   : > { %p461_p5 = pnand %p460_p3, %p456_p0 }
  0x1e   : > { %239 = vperm.xlu0 %436, %v236_v2  }
  0x88   : > { %v233_v3 = vpop.permute.xlu0 %232 }
  0x89   : > { %v235_v5 = vmul.f32 %v233_v3, %v228_v4 }
  0x90   : > { %v240_v6 = vpop.permute.xlu0 %239 }
  0x91   : > { %v242_v7 = vadd.f32 %v240_v6, %v235_v5 }
  0x93   : > { %243 = vst [vmem:[%s211_s21] sm:$0xff] %v242_v7 }
  0x94   : > { %464 = shalt.err (!%p461_p5)
}
  0x95   : > { %380 = dma.vmem_to_hbm [thread:$0]  (%p578_p4), %s260_s23, 128, %s262_s26, %s245_s15  }
  0x96 PF: > { %p386_p6 = scmp.ge.s32.totalorder %s515_s17, 2  ;;  %s273_s4 = sand.u32 1, %s495_s12  }
  0x97   : > { %s274_s8 = scalar_lea.sflag [#allocation3], %s273_s4 }
  0x98   : > { %p383_p7 = pnand %p386_p6, %p585_p8 }
  0x9a   : > { %p384_p9 = pneg %p383_p7 }
  0x9c   : > { %490 = dma.done.wait (%p384_p9), %s274_s8, 128  }
  0x9d   : > { %492 = vsyncadd (%p384_p9), %s274_s8, 4294967168  ;;  %s16_s17 = sadd.s32 1, %s515_s17   ;;  %s647_s12 = smov %s499_s13 }
  0x9e   : > { %p13_p10 = scmp.ge.s32.totalorder %s16_s17, 4   ;;  %s648_s13 = smov %s503_s14 }
  0x9f   : > { %s649_s14 = smov %s591_s25  ;;  %s650_s15 = smov %s511_s16 }
  0xa0   : > { %s651_s16 = smov %s653_s20  ;;  %15 = sbr.rel (!%p13_p10) target bundleno = 4 (0x4), region = 73 }
  0xa5   :  { %280 = vsyncpa [#allocation3], 1 }
  0xa6   :  { %282 = vsyncpa [#allocation3 + $0x1], 1 }

</bundles_post_ra>
